<compile_context>
chip_gen: v7x
topology: tpu7x:2x2x1
jax: 0.10.0
libtpu: 0.0.40
codegen_flags: <defaults>
</compile_context>

<pallas_src>
import math
from functools import partial

import jax
import jax.numpy as jnp
from jax.experimental import pallas as pl
from jax.experimental.pallas import tpu as pltpu


# ---------------------------------------------------------------------------
# Fused kernel: (omeg Linear folded) + broadcast + concat + 3-layer Swish MLP
# ---------------------------------------------------------------------------

def _fused_predictor_kernel(omega_ref, lat_ref, w_omg_ref, w_lat_ref, b1_ref,
                            w2_ref, b2_ref, w3t_ref, b3_ref, out_ref, a_scr,
                            *, compute_dtype):
    b = pl.program_id(1)

    # Layer-1 omega contribution depends only on the N-tile: compute it once
    # per tile (inner batch index == 0) and reuse it from VMEM scratch.
    @pl.when(b == 0)
    def _():
        a_scr[...] = jnp.dot(omega_ref[...], w_omg_ref[...],
                             preferred_element_type=jnp.float32)

    # Layer-1 latent contribution for this batch row (+ combined bias).
    lat_row = lat_ref[0]                                        # (1, L)
    c = jnp.dot(lat_row, w_lat_ref[...],
                preferred_element_type=jnp.float32) + b1_ref[...]   # (1, H)

    h = a_scr[...] + c                                          # (tm, H) f32
    h = h * jax.nn.sigmoid(h)                                   # Swish (f32)

    z = jnp.dot(h.astype(compute_dtype), w2_ref[...],
                preferred_element_type=jnp.float32) + b2_ref[...]   # (tm, H)
    z = z * jax.nn.sigmoid(z)                                   # Swish (f32)

    # Final layer computed transposed so the long row axis is the lane axis
    # of the store:  out_t[d, r] = sum_h w3[h, d] * z[r, h] + b3[d].
    out_t = jax.lax.dot_general(
        w3t_ref[...], z.astype(compute_dtype),
        dimension_numbers=(((1,), (1,)), ((), ())),
        preferred_element_type=jnp.float32) + b3_ref[...]       # (D_out, tm)

    out_ref[0] = out_t.astype(out_ref.dtype)


# ---------------------------------------------------------------------------
# Wrapper (matches CFPredictor.forward semantics)
# ---------------------------------------------------------------------------

def cf_predictor_forward(params, latent_state, omega_sequence, *,
                         mxu_dtype=jnp.float32, tm=None):
    """Returns (N, B, 2*output_dim), identical semantics to the torch module."""
    N, R = omega_sequence.shape
    B, L = latent_state.shape
    w1 = params["w1"]
    H = w1.shape[1]
    D_out = params["w3"].shape[1]                  # == 2 * output_dim

    # ---- trace-time algebra: fold omeg_fc into the first predictor layer ----
    w1_lat = w1[:L, :]                             # latent half of layer 1
    w1_omg = w1[L:, :]                             # omega half of layer 1
    w_omg = params["omeg_w"] @ w1_omg              # (R, H)
    b1c = (params["omeg_b"] @ w1_omg + params["b1"]).reshape(1, H)
    w3t = params["w3"].T                           # (D_out, H)
    b3c = params["b3"].reshape(D_out, 1)
    b2r = params["b2"].reshape(1, H)

    cdt = mxu_dtype                                # bf16 on v6e/v7x, f32 on v5e
    omega_in = omega_sequence.astype(cdt)
    latent_in = latent_state.reshape(B, 1, L).astype(cdt)
    w_omg_in, w_lat_in = w_omg.astype(cdt), w1_lat.astype(cdt)
    w2_in, w3t_in = params["w2"].astype(cdt), w3t.astype(cdt)

    # ---- tiling: one big row tile (multiple of 128 once N is large) --------
    if tm is None:
        tm = N if N <= 256 else 256                # >=2 parallel steps if N>256
    n_tiles = pl.cdiv(N, tm)

    # ---- rough VMEM budget; raise scoped limit only when actually needed ---
    isz = jnp.finfo(cdt).bits // 8
    est = (2 * tm * R * isz + 2 * L * isz + 2 * D_out * tm * 4   # pipelined blocks
           + (R * H + L * H + H * H + D_out * H) * isz           # resident weights
           + (2 * H + D_out) * 4                                 # biases
           + tm * H * 4)                                         # scratch
    compiler_kwargs = dict(dimension_semantics=("parallel", "arbitrary"))
    if est > 16 * 2**20:                           # v5e default scoped = 16 MiB
        compiler_kwargs["vmem_limit_bytes"] = int(min(2 * est, 64 * 2**20))

    kernel = partial(_fused_predictor_kernel, compute_dtype=cdt)
    out_t = pl.pallas_call(
        kernel,
        out_shape=jax.ShapeDtypeStruct((B, D_out, N), jnp.float32),
        grid_spec=pltpu.PrefetchScalarGridSpec(
            num_scalar_prefetch=0,
            grid=(n_tiles, B),
            in_specs=[
                pl.BlockSpec((tm, R), lambda i, b: (i, 0)),        # omega tile
                pl.BlockSpec((1, 1, L), lambda i, b: (b, 0, 0)),   # latent row
                pl.BlockSpec((R, H), lambda i, b: (0, 0)),         # folded W_omg
                pl.BlockSpec((L, H), lambda i, b: (0, 0)),         # W_lat
                pl.BlockSpec((1, H), lambda i, b: (0, 0)),         # combined b1
                pl.BlockSpec((H, H), lambda i, b: (0, 0)),         # w2
                pl.BlockSpec((1, H), lambda i, b: (0, 0)),         # b2
                pl.BlockSpec((D_out, H), lambda i, b: (0, 0)),     # w3^T
                pl.BlockSpec((D_out, 1), lambda i, b: (0, 0)),     # b3
            ],
            out_specs=pl.BlockSpec((1, D_out, tm), lambda i, b: (b, 0, i)),
            scratch_shapes=[pltpu.VMEM((tm, H), jnp.float32)],     # A cache
        ),
        compiler_params=pltpu.CompilerParams(**compiler_kwargs),
    )(omega_in, latent_in, w_omg_in, w_lat_in, b1c, w2_in, b2r, w3t_in, b3c)

    return jnp.transpose(out_t, (2, 0, 1))         # (N, B, 2*output_dim)


# ---------------------------------------------------------------------------
# Parameter construction (deterministic, mirrors CFPredictor.__init__)
# ---------------------------------------------------------------------------

def init_params(key, latent_state_dim, rew_seq_in_dim, hidden_dim,
                omg_seq_out_dim, output_dim):
    ortho = jax.nn.initializers.orthogonal()       # weight_init -> orthogonal
    ks = jax.random.split(key, 4)
    D_in = latent_state_dim + omg_seq_out_dim
    D_out = 2 * output_dim                         # self.output_dim = 2*output_dim
    params = {
        # omeg_fc: mlp(rew_seq_in_dim, 0, omg_seq_out_dim, 0) == single Linear
        "omeg_w": ortho(ks[0], (rew_seq_in_dim, omg_seq_out_dim), jnp.float32),
        "omeg_b": jnp.zeros((omg_seq_out_dim,), jnp.float32),
        # predictor: Linear(D_in,H) Swish Linear(H,H) Swish Linear(H,D_out)
        "w1": ortho(ks[1], (D_in, hidden_dim), jnp.float32),
        "b1": jnp.zeros((hidden_dim,), jnp.float32),
        "w2": ortho(ks[2], (hidden_dim, hidden_dim), jnp.float32),
        "b2": jnp.zeros((hidden_dim,), jnp.float32),
        "w3": ortho(ks[3], (hidden_dim, D_out), jnp.float32),
        "b3": jnp.zeros((D_out,), jnp.float32),
        # omega distribution parameters (not used by forward(), kept for parity)
        "omega_mu": jnp.zeros((rew_seq_in_dim,), jnp.float32),
        "omega_logstd": jnp.full((rew_seq_in_dim,),
                                 math.atanh(6.0 / 8.0), jnp.float32),
    }
    # TODO(synk): aseq_fc / rseq_fc / the omega sampling property and the
    # infos/log bookkeeping are not on the forward() path and are not kernelized.
    return params


# ---------------------------------------------------------------------------
# Pure-JAX reference (unfused, mirrors the torch forward exactly)
# ---------------------------------------------------------------------------

def cf_predictor_forward_ref(params, latent_state, omega_sequence):
    N, _ = omega_sequence.shape
    B, latent_dim = latent_state.shape
    h_ws = omega_sequence @ params["omeg_w"] + params["omeg_b"]
    h_ws_e = jnp.broadcast_to(h_ws[:, None, :], (N, B, h_ws.shape[-1]))
    h_e = jnp.broadcast_to(latent_state[None, :, :], (N, B, latent_dim))
    x = jnp.concatenate([h_e, h_ws_e], axis=-1)
    h = x @ params["w1"] + params["b1"]; h = h * jax.nn.sigmoid(h)
    h = h @ params["w2"] + params["b2"]; h = h * jax.nn.sigmoid(h)
    return h @ params["w3"] + params["b3"]


# ---------------------------------------------------------------------------

if __name__ == "__main__":
    latent_state_dim = 16
    rew_seq_in_dim = 8
    hidden_dim = 32
    omg_seq_out_dim = 5
    output_dim = 1
    B = 2            # batch size
    N = 8            # number of omega samples (rows of omega_sequence)

    key = jax.random.PRNGKey(0)
    k_p, k_x, k_w = jax.random.split(key, 3)
    params = init_params(k_p, latent_state_dim, rew_seq_in_dim, hidden_dim,
                         omg_seq_out_dim, output_dim)
    latent_state = jax.random.normal(k_x, (B, latent_state_dim), jnp.float32)
    omega_sequence = jax.random.normal(k_w, (N, rew_seq_in_dim), jnp.float32)

    ref = cf_predictor_forward_ref(params, latent_state, omega_sequence)

    # f32 MXU path (tight tolerance; only the trace-time fold reorders math).
    out = jax.block_until_ready(
        cf_predictor_forward(params, latent_state, omega_sequence))
    assert out.shape == (N, B, 2 * output_dim), out.shape
    assert jnp.allclose(out, ref, atol=2e-4, rtol=2e-4), \
        float(jnp.max(jnp.abs(out - ref)))

    # bf16 MXU operands (v6e/v7x fast path; Swish/bias/accum stay f32).
    out_bf16 = jax.block_until_ready(
        cf_predictor_forward(params, latent_state, omega_sequence,
                             mxu_dtype=jnp.bfloat16))
    assert out_bf16.shape == (N, B, 2 * output_dim), out_bf16.shape
    assert jnp.allclose(out_bf16, ref, atol=1e-1, rtol=1e-1), \
        float(jnp.max(jnp.abs(out_bf16 - ref)))

    print("KERNEL_OK")
</pallas_src>

<mosaic_0001>
module attributes {stable_mosaic.version = 11 : i64} {
  func.func @_fused_predictor_kernel(%arg0: i32, %arg1: i32, %arg2: memref<8x8xf32, #tpu.memory_space<vmem>>, %arg3: memref<1x1x16xf32, #tpu.memory_space<vmem>>, %arg4: memref<8x32xf32, #tpu.memory_space<vmem>>, %arg5: memref<16x32xf32, #tpu.memory_space<vmem>>, %arg6: memref<1x32xf32, #tpu.memory_space<vmem>>, %arg7: memref<32x32xf32, #tpu.memory_space<vmem>>, %arg8: memref<1x32xf32, #tpu.memory_space<vmem>>, %arg9: memref<2x32xf32, #tpu.memory_space<vmem>>, %arg10: memref<2x1xf32, #tpu.memory_space<vmem>>, %arg11: memref<1x2x8xf32, #tpu.memory_space<vmem>>, %arg12: memref<8x32xf32, #tpu.memory_space<vmem>>) attributes {dimension_semantics = [#tpu.dimension_semantics<parallel>, #tpu.dimension_semantics<arbitrary>], iteration_bounds = array<i64: 1, 2>, scalar_prefetch = 0 : i64, scratch_operands = 1 : i64, tpu.core_type = #tpu.core_type<tc>, window_params = [{transform_indices = @transform_0, window_bounds = array<i64: 8, 8>}, {transform_indices = @transform_1, window_bounds = array<i64: 1, 1, 16>}, {pipeline_mode = #tpu.pipeline_mode<synchronous>, transform_indices = @transform_2, window_bounds = array<i64: 8, 32>}, {pipeline_mode = #tpu.pipeline_mode<synchronous>, transform_indices = @transform_3, window_bounds = array<i64: 16, 32>}, {pipeline_mode = #tpu.pipeline_mode<synchronous>, transform_indices = @transform_4, window_bounds = array<i64: 1, 32>}, {pipeline_mode = #tpu.pipeline_mode<synchronous>, transform_indices = @transform_5, window_bounds = array<i64: 32, 32>}, {pipeline_mode = #tpu.pipeline_mode<synchronous>, transform_indices = @transform_6, window_bounds = array<i64: 1, 32>}, {pipeline_mode = #tpu.pipeline_mode<synchronous>, transform_indices = @transform_7, window_bounds = array<i64: 2, 32>}, {pipeline_mode = #tpu.pipeline_mode<synchronous>, transform_indices = @transform_8, window_bounds = array<i64: 2, 1>}, {transform_indices = @transform_9, window_bounds = array<i64: 1, 2, 8>}]} {
    %c0_i32 = arith.constant 0 : i32
    %0 = arith.cmpi eq, %arg1, %c0_i32 : i32
    %1 = arith.extui %0 : i1 to i32
    %c0_i32_0 = arith.constant 0 : i32
    %2 = arith.cmpi ne, %1, %c0_i32_0 : i32
    scf.if %2 {
      %c0_24 = arith.constant 0 : index
      %c0_25 = arith.constant 0 : index
      %37 = vector.load %arg2[%c0_24, %c0_25] : memref<8x8xf32, #tpu.memory_space<vmem>>, vector<8x8xf32>
      %c0_26 = arith.constant 0 : index
      %c0_27 = arith.constant 0 : index
      %38 = vector.load %arg4[%c0_26, %c0_27] : memref<8x32xf32, #tpu.memory_space<vmem>>, vector<8x32xf32>
      %cst_28 = arith.constant dense<0.000000e+00> : vector<8x32xf32>
      %39 = tpu.matmul %37, %38, %cst_28 {dimension_numbers = #tpu.dot_dimension_numbers<[1], [0], [0], [1], [0, 0, 1, 1], [], []>} : vector<8x8xf32>, vector<8x32xf32>, vector<8x32xf32> -> vector<8x32xf32>
      %c0_29 = arith.constant 0 : index
      %c0_30 = arith.constant 0 : index
      %40 = vector.load %arg12[%c0_29, %c0_30] : memref<8x32xf32, #tpu.memory_space<vmem>>, vector<8x32xf32>
      tpu.vector_store %arg12[%c0_29, %c0_30], %39 {strides = array<i32>} : memref<8x32xf32, #tpu.memory_space<vmem>>, vector<8x32xf32>,
    } else {
    }
    %c0 = arith.constant 0 : index
    %c0_1 = arith.constant 0 : index
    %c0_2 = arith.constant 0 : index
    %3 = vector.load %arg3[%c0, %c0_1, %c0_2] : memref<1x1x16xf32, #tpu.memory_space<vmem>>, vector<1x1x16xf32>
    %4 = vector.shape_cast %3 : vector<1x1x16xf32> to vector<1x16xf32>
    %c0_3 = arith.constant 0 : index
    %c0_4 = arith.constant 0 : index
    %5 = vector.load %arg5[%c0_3, %c0_4] : memref<16x32xf32, #tpu.memory_space<vmem>>, vector<16x32xf32>
    %cst = arith.constant dense<0.000000e+00> : vector<1x32xf32>
    %6 = tpu.matmul %4, %5, %cst {dimension_numbers = #tpu.dot_dimension_numbers<[1], [0], [0], [1], [0, 0, 1, 1], [], []>} : vector<1x16xf32>, vector<16x32xf32>, vector<1x32xf32> -> vector<1x32xf32>
    %c0_5 = arith.constant 0 : index
    %c0_6 = arith.constant 0 : index
    %7 = vector.load %arg6[%c0_5, %c0_6] : memref<1x32xf32, #tpu.memory_space<vmem>>, vector<1x32xf32>
    %8 = arith.addf %6, %7 : vector<1x32xf32>
    %c0_7 = arith.constant 0 : index
    %c0_8 = arith.constant 0 : index
    %9 = vector.load %arg12[%c0_7, %c0_8] : memref<8x32xf32, #tpu.memory_space<vmem>>, vector<8x32xf32>
    %10 = vector.broadcast %8 : vector<1x32xf32> to vector<8x32xf32>
    %11 = arith.addf %9, %10 : vector<8x32xf32>
    %12 = arith.negf %11 : vector<8x32xf32>
    %13 = math.exp %12 : vector<8x32xf32>
    %cst_9 = arith.constant 1.000000e+00 : f32
    %14 = vector.broadcast %cst_9 : f32 to vector<8x32xf32>
    %15 = arith.addf %14, %13 : vector<8x32xf32>
    %16 = arith.divf %14, %15 : vector<8x32xf32>
    %17 = arith.mulf %11, %16 : vector<8x32xf32>
    %c0_10 = arith.constant 0 : index
    %c0_11 = arith.constant 0 : index
    %18 = vector.load %arg7[%c0_10, %c0_11] : memref<32x32xf32, #tpu.memory_space<vmem>>, vector<32x32xf32>
    %cst_12 = arith.constant dense<0.000000e+00> : vector<8x32xf32>
    %19 = tpu.matmul %17, %18, %cst_12 {dimension_numbers = #tpu.dot_dimension_numbers<[1], [0], [0], [1], [0, 0, 1, 1], [], []>} : vector<8x32xf32>, vector<32x32xf32>, vector<8x32xf32> -> vector<8x32xf32>
    %c0_13 = arith.constant 0 : index
    %c0_14 = arith.constant 0 : index
    %20 = vector.load %arg8[%c0_13, %c0_14] : memref<1x32xf32, #tpu.memory_space<vmem>>, vector<1x32xf32>
    %21 = vector.broadcast %20 : vector<1x32xf32> to vector<8x32xf32>
    %22 = arith.addf %19, %21 : vector<8x32xf32>
    %23 = arith.negf %22 : vector<8x32xf32>
    %24 = math.exp %23 : vector<8x32xf32>
    %cst_15 = arith.constant 1.000000e+00 : f32
    %25 = vector.broadcast %cst_15 : f32 to vector<8x32xf32>
    %26 = arith.addf %25, %24 : vector<8x32xf32>
    %27 = arith.divf %25, %26 : vector<8x32xf32>
    %28 = arith.mulf %22, %27 : vector<8x32xf32>
    %c0_16 = arith.constant 0 : index
    %c0_17 = arith.constant 0 : index
    %29 = vector.load %arg9[%c0_16, %c0_17] : memref<2x32xf32, #tpu.memory_space<vmem>>, vector<2x32xf32>
    %cst_18 = arith.constant dense<0.000000e+00> : vector<2x8xf32>
    %30 = tpu.matmul %29, %28, %cst_18 {dimension_numbers = #tpu.dot_dimension_numbers<[1], [1], [0], [0], [0, 0, 1, 0], [], []>} : vector<2x32xf32>, vector<8x32xf32>, vector<2x8xf32> -> vector<2x8xf32>
    %c0_19 = arith.constant 0 : index
    %c0_20 = arith.constant 0 : index
    %31 = vector.load %arg10[%c0_19, %c0_20] : memref<2x1xf32, #tpu.memory_space<vmem>>, vector<2x1xf32>
    %32 = vector.broadcast %31 : vector<2x1xf32> to vector<2x8xf32>
    %33 = arith.addf %30, %32 : vector<2x8xf32>
    %c0_21 = arith.constant 0 : index
    %c0_22 = arith.constant 0 : index
    %c0_23 = arith.constant 0 : index
    %34 = vector.load %arg11[%c0_21, %c0_22, %c0_23] : memref<1x2x8xf32, #tpu.memory_space<vmem>>, vector<1x2x8xf32>
    %35 = vector.shape_cast %34 : vector<1x2x8xf32> to vector<2x8xf32>
    %36 = vector.shape_cast %33 : vector<2x8xf32> to vector<1x2x8xf32>
    tpu.vector_store %arg11[%c0_21, %c0_22, %c0_23], %36 {strides = array<i32>} : memref<1x2x8xf32, #tpu.memory_space<vmem>>, vector<1x2x8xf32>,
    return
  }
  func.func @transform_0(%arg0: i32, %arg1: i32) -> (i32, i32) {
    %c0_i32 = arith.constant 0 : i32
    %c0_i32_0 = arith.constant 0 : i32
    return %arg0, %c0_i32 : i32, i32
  }
  func.func @transform_1(%arg0: i32, %arg1: i32) -> (i32, i32, i32) {
    %c0_i32 = arith.constant 0 : i32
    %c0_i32_0 = arith.constant 0 : i32
    %c0_i32_1 = arith.constant 0 : i32
    return %arg1, %c0_i32, %c0_i32_0 : i32, i32, i32
  }
  func.func @transform_2(%arg0: i32, %arg1: i32) -> (i32, i32) {
    %c0_i32 = arith.constant 0 : i32
    %c0_i32_0 = arith.constant 0 : i32
    %c0_i32_1 = arith.constant 0 : i32
    return %c0_i32, %c0_i32_0 : i32, i32
  }
  func.func @transform_3(%arg0: i32, %arg1: i32) -> (i32, i32) {
    %c0_i32 = arith.constant 0 : i32
    %c0_i32_0 = arith.constant 0 : i32
    %c0_i32_1 = arith.constant 0 : i32
    return %c0_i32, %c0_i32_0 : i32, i32
  }
  func.func @transform_4(%arg0: i32, %arg1: i32) -> (i32, i32) {
    %c0_i32 = arith.constant 0 : i32
    %c0_i32_0 = arith.constant 0 : i32
    %c0_i32_1 = arith.constant 0 : i32
    return %c0_i32, %c0_i32_0 : i32, i32
  }
  func.func @transform_5(%arg0: i32, %arg1: i32) -> (i32, i32) {
    %c0_i32 = arith.constant 0 : i32
    %c0_i32_0 = arith.constant 0 : i32
    %c0_i32_1 = arith.constant 0 : i32
    return %c0_i32, %c0_i32_0 : i32, i32
  }
  func.func @transform_6(%arg0: i32, %arg1: i32) -> (i32, i32) {
    %c0_i32 = arith.constant 0 : i32
    %c0_i32_0 = arith.constant 0 : i32
    %c0_i32_1 = arith.constant 0 : i32
    return %c0_i32, %c0_i32_0 : i32, i32
  }
  func.func @transform_7(%arg0: i32, %arg1: i32) -> (i32, i32) {
    %c0_i32 = arith.constant 0 : i32
    %c0_i32_0 = arith.constant 0 : i32
    %c0_i32_1 = arith.constant 0 : i32
    return %c0_i32, %c0_i32_0 : i32, i32
  }
  func.func @transform_8(%arg0: i32, %arg1: i32) -> (i32, i32) {
    %c0_i32 = arith.constant 0 : i32
    %c0_i32_0 = arith.constant 0 : i32
    %c0_i32_1 = arith.constant 0 : i32
    return %c0_i32, %c0_i32_0 : i32, i32
  }
  func.func @transform_9(%arg0: i32, %arg1: i32) -> (i32, i32, i32) {
    %c0_i32 = arith.constant 0 : i32
    %c0_i32_0 = arith.constant 0 : i32
    return %arg1, %c0_i32, %arg0 : i32, i32, i32
  }
}

</mosaic_0001>

<bundles_post_ra>
// kernel: tpu_custom_call.1
= control target key start
LH: loop header
LB: loop body
LE: loop exit
PB: predicated region body
PF: predicated region fallthrough
CT: control target
= control target key end

     0   :  { %14 = vsyncpa [#allocation4], 0  ;;  %s1499_s0 = inlined_call_operand.hbm [shape: f32[8,8], index: 0, kind: input, shape index: {}]   ;;  %s1500_s1 = inlined_call_operand.vmem [shape: f32[2,1,16], index: 1, kind: input, shape index: {}]   ;;  %s1501_s2 = inlined_call_operand.vmem [shape: f32[8,32], index: 2, kind: input, shape index: {}]   ;;  %s1502_s3 = inlined_call_operand.hbm [shape: f32[16,32], index: 3, kind: input, shape index: {}]   ;;  %s1503_s4 = inlined_call_operand.vmem [shape: f32[1,32], index: 4, kind: input, shape index: {}]   ;;  %s1504_s5 = inlined_call_operand.hbm [shape: f32[32,32], index: 5, kind: input, shape index: {}]   ;;  %s1505_s6 = inlined_call_operand.vmem [shape: f32[1,32], index: 6, kind: input, shape index: {}]   ;;  %s1506_s7 = inlined_call_operand.vmem [shape: f32[2,32], index: 7, kind: input, shape index: {}]   ;;  %s1507_s8 = inlined_call_operand.vmem [shape: f32[2,1], index: 8, kind: input, shape index: {}]   ;;  %s1508_s9 = inlined_call_operand.hbm [shape: f32[2,2,8], index: 9, kind: output, shape index: {}]  }
   0x1   :  { %15 = vsyncpa [#allocation7], 0 }
   0x2   :  { %16 = vsyncpa [#allocation5], 0 }
   0x3   :  { %18 = vsyncpa [#allocation5 + $0x1], 0  ;;  %s1262_s30 = smov 0   ;;  %s1264_s10 = smov 0  }
   0x4   :  { %s1266_s11 = smov 0   ;;  %s1268_s12 = smov 0  }
   0x5   :  { %s1270_s13 = smov 0   ;;  %s1272_s14 = smov 0  }
   0x6 LB: > { %1519 = sst [smem:[#allocation13_spill]] %s1178_s30  ;;  %s851_s15 = sadd.s32 4294967295, %s1198_s14   ;;  %s1198_s14 = sphi %s1272_s14, %s24_s14   ;;  %s1194_s13 = sphi %s1270_s13, %s1541_s13   ;;  %s1190_s12 = sphi %s1268_s12, %s1540_s12   ;;  %s1186_s11 = sphi %s1266_s11, %s1539_s11   ;;  %s1182_s10 = sphi %s1264_s10, %s1543_s10   ;;  %s1178_s30 = sphi %s1262_s30, %s1542_s30  }
   0x7   : > { %1520 = sst [smem:[#allocation14_spill]] %s1186_s11  ;;  %s852_s16 = sadd.s32 4294967294, %s1198_s14  }
   0x8   : > { %1521 = sst [smem:[#allocation15_spill]] %s1194_s13  ;;  %s33_s17 = sadd.s32 1, %s1194_s13 }
   0x9   : > { %s244_s18 = sadd.s32 1, %s1186_s11  ;;  %p34_p0 = scmp.ge.s32.totalorder %s33_s17, 2 }
   0xa   : > { %p254_p1 = scmp.ne.s32.totalorder %s1186_s11, %s1182_s10  ;;  %p255_p2 = scmp.eq.s32.totalorder %s851_s15, 1 }
   0xb   : > { %p260_p3 = scmp.ne.s32.totalorder %s1182_s10, %s1178_s30  ;;  %s1545_s17 = smov (%p34_p0, %s33_s17), 0 }
   0xc   : > { %1522 = sst [smem:[#allocation16_spill]] %s1545_s17  ;;  %p1302_p4 = por %p255_p2, %p254_p1 }
   0xd   : > { %p261_p5 = scmp.eq.s32.totalorder %s852_s16, 1  ;;  %s239_s20 = ssub.s32 %s1194_s13, %s1545_s17 }
   0xe   : > { %s1523_s19 = scalar_select %p1302_p4, 1, 0 }
   0xf   : > { %p853_p6 = scmp.ge.s32.totalorder %s1198_s14, 1  ;;  %p242_p7 = scmp.eq.s32.totalorder %s239_s20, 0 }
  0x10   : > { %p1309_p8 = por %p261_p5, %p260_p3  ;;  %p268_p9 = scmp.lt.s32.totalorder %s1198_s14, 3 }
  0x11   : > { %s1315_s22 = scalar_select %p242_p7, %s1186_s11, %s244_s18  }
  0x12   : > { %s1524_s21 = scalar_select %p1309_p8, 1, 0 }
  0x13   : > { %1526 = sst [smem:[#allocation18_spill]] %s1315_s22  ;;  %p1317_p10 = pnand %p853_p6, %p268_p9 }
  0x14   : > { %1525 = sst [smem:[#allocation17_spill]] %s1524_s21  ;;  %p1321_p11 = scmp.eq.s32.totalorder %s851_s15, 0 }
  0x15   : > { %s1527_s23 = scalar_select %p1317_p10, 1, 0 }
  0x16   : > { %s1528_s24 = scalar_select %p1321_p11, 1, 0 }
  0x17   : > { %p939_p12 = pneg %p1317_p10  ;;  %s1200_s25 = smov [#allocation6]  }
  0x18   : > { %s296_s26 = sshll.u32 %s1200_s25, 4  ;;  %s1201_s28 = smov [#allocation3]   ;;  %s297_s26 = int_to_ptr.vmem [resolvable:$true] %s296_s26 }
  0x19   : > { %p1329_p13 = pnand %p1321_p11, %p939_p12  ;;  %s283_s29 = sshll.u32 %s1201_s28, 4  ;;  %s284_s29 = int_to_ptr.vmem [resolvable:$true] %s283_s29 }
  0x1a   : > { %s1028_s15 = scalar_lea.hbm %s1502_s3, 256 }
  0x1b   : > { %p1029_p0 = scmp.ne.s32.totalorder %s1502_s3, %s1028_s15  ;;  %p1341_p1 = pneg %p1329_p13 }
  0x1c   : > { %p1035_p5 = scmp.lt.u32.totalorder %s1028_s15, %s1502_s3 }
  0x1d   : > { %p1031_p2 = pnand %p1341_p1, %p1029_p0 }
  0x1f   : > { %p1032_p3 = pneg %p1031_p2 }
  0x21   : > { %p1037_p6 = pnand %p1035_p5, %p1032_p3 }
  0x23   : > { %1040 = shalt.err (!%p1037_p6)
}
  0x24   : > { %s1041_s28 = scalar_lea.vmem %s297_s26, 256  ;;  %p1049_p8 = scmp.lt.s32.totalorder %s297_s26, %s297_s26 }
  0x25   : > { %p1042_p7 = scmp.ne.s32.totalorder %s297_s26, %s1041_s28  ;;  %p1050_p4 = scmp.lt.s32.totalorder %s1041_s28, %s1041_s28 }
  0x27   : > { %p1044_p9 = pnand %p1042_p7, %p1341_p1  ;;  %p1051_p11 = por %p1050_p4, %p1049_p8 }
  0x29   : > { %p1045_p12 = pneg %p1044_p9 }
  0x2b   : > { %p1052_p10 = pnand %p1051_p11, %p1045_p12 }
  0x2d   : > { %1055 = shalt.err (!%p1052_p10)
}
  0x2e   : > { %s1518_s17 = smov 128   ;;  %s1203_s16 = smov 8  }
  0x2f   : > { %945 = dma.hbm_to_vmem [thread:$0]  (!%p1329_p13), %s1502_s3, 256, %s297_s26, [#allocation7], %s1518_s17, %s1518_s17, %s1203_s16  }
  0x30   : > { %s1056_s20 = scalar_lea.hbm %s1499_s0, 128 }
  0x31   : > { %p1057_p4 = scmp.ne.s32.totalorder %s1499_s0, %s1056_s20  ;;  %p1063_p11 = scmp.lt.u32.totalorder %s1056_s20, %s1499_s0 }
  0x33   : > { %p1059_p8 = pnand %p1057_p4, %p1341_p1 }
  0x35   : > { %p1060_p10 = pneg %p1059_p8 }
  0x37   : > { %p1065_p0 = pnand %p1063_p11, %p1060_p10 }
  0x39   : > { %1068 = shalt.err (!%p1065_p0)
}
  0x3a   : > { %s1069_s13 = scalar_lea.vmem %s284_s29, 128  ;;  %p1077_p6 = scmp.lt.s32.totalorder %s284_s29, %s284_s29 }
  0x3b   : > { %p1070_p2 = scmp.ne.s32.totalorder %s284_s29, %s1069_s13  ;;  %p1078_p7 = scmp.lt.s32.totalorder %s1069_s13, %s1069_s13 }
  0x3d   : > { %p1072_p3 = pnand %p1070_p2, %p1341_p1  ;;  %p1079_p9 = por %p1078_p7, %p1077_p6 }
  0x3f   : > { %p1073_p5 = pneg %p1072_p3 }
  0x41   : > { %p1080_p12 = pnand %p1079_p9, %p1073_p5 }
  0x43   : > { %1083 = shalt.err (!%p1080_p12)
}
  0x44   : > { %942 = dma.hbm_to_vmem [thread:$0]  (!%p1329_p13), %s1499_s0, 128, %s284_s29, [#allocation4]  }
  0x45   : > { %s1204_s30 = smov [#allocation8]   ;;  %s1084_s15 = scalar_lea.hbm %s1504_s5, 512 }
  0x46   : > { %s312_s21 = sshll.u32 %s1204_s30, 4  ;;  %p1085_p4 = scmp.ne.s32.totalorder %s1504_s5, %s1084_s15  ;;  %s313_s21 = int_to_ptr.vmem [resolvable:$true] %s312_s21 }
  0x47   : > { %p1091_p11 = scmp.lt.u32.totalorder %s1084_s15, %s1504_s5 }
  0x48   : > { %p1087_p8 = pnand %p1085_p4, %p1341_p1 }
  0x4a   : > { %p1088_p10 = pneg %p1087_p8 }
  0x4c   : > { %p1093_p0 = pnand %p1091_p11, %p1088_p10 }
  0x4e   : > { %1096 = shalt.err (!%p1093_p0)
}
  0x4f   : > { %s1097_s29 = scalar_lea.vmem %s313_s21, 512  ;;  %p1105_p6 = scmp.lt.s32.totalorder %s313_s21, %s313_s21 }
  0x50   : > { %p1098_p2 = scmp.ne.s32.totalorder %s313_s21, %s1097_s29  ;;  %p1106_p7 = scmp.lt.s32.totalorder %s1097_s29, %s1097_s29 }
  0x52   : > { %p1100_p3 = pnand %p1098_p2, %p1341_p1  ;;  %p1107_p9 = por %p1106_p7, %p1105_p6 }
  0x54   : > { %p1101_p5 = pneg %p1100_p3 }
  0x56   : > { %p1108_p12 = pnand %p1107_p9, %p1101_p5 }
  0x58   : > { %1111 = shalt.err (!%p1108_p12)
}
  0x59   : > { %s1531_s11 = smov 128   ;;  %p1532_p4 = scmp.ne.s32.totalorder %s1527_s23, 0 }
  0x5a   : > { %948 = dma.hbm_to_vmem [thread:$0]  (!%p1329_p13), %s1504_s5, 512, %s313_s21, [#allocation7], %s1531_s11, %s1531_s11, %s1203_s16  }
  0x5b   : > { %343 = sbr.rel (%p1532_p4) target bundleno = 1045 (0x415), region = 56  ;;  %p1533_p1 = scmp.ne.s32.totalorder (!%p1532_p4), %s1528_s24, 0 }
  0x62   : > { %1165 = dma.done.wait (%p1533_p1), [#allocation4], 128  }
  0x63   : > { %1167 = vsyncadd (%p1533_p1), [#allocation4], 4294967168 }
  0x64   : > { %1169 = dma.done.wait (%p1533_p1), [#allocation7], 768  }
  0x65   : > { %1171 = vsyncadd (%p1533_p1), [#allocation7], 4294966528  ;;  %s382_s27 = sand.u32 1, %s1182_s10   ;;  %p385_p13 = scmp.lt.s32.totalorder %s1190_s12, 1 }
  0x66   : > { %s1413_s23 = sshll.u32 %s382_s27, 1  ;;  %p863_p8 = scmp.ne.s32.totalorder %s1190_s12, 0 }
  0x67   : > { %s1416_s25 = scalar_select %p385_p13, %s1190_s12, 1 }
  0x68   : > { %s384_s22 = scalar_lea.vmem [#allocation9], %s1413_s23  ;;  %391 = sbr.rel (%p863_p8) target bundleno = 320 (0x140), region = 72  ;;  %v393_v0 = vld [vmem:[%s1501_s2] sm:$0xff] (!%p863_p8)  ;;  %v392_v1 = vld [vmem:[#allocation3] sm:$0xff] (!%p863_p8)  ;;  %vm394_vm0 = vcmask (!%p863_p8), 64512   ;;  %v1205_v2 = vmov (!%p863_p8), 0.0  }
  0x69   : > { %s387_s21 = scalar_lea.vmem %s1500_s1, %s1416_s25  ;;  %888 = vmatprep.subr.mxu0 (!%p863_p8), %v1205_v2  ;;  %vm1206_vm1 = vmmov (!%p863_p8), 0   ;;  %vm468_vm2 = vcmask (!%p863_p8), 261120  }
  0x6a   : > { %890 = vmatprep.mubr.msk.f32.mxu0 (!%p863_p8), %vm1206_vm1, %v1205_v2  ;;  %889 = vmatpush3.msra.mxu0 (!%p863_p8), %v393_v0 }
  0x6b   : > { %891 = vmatmul.mubr.msk.f32.vlgmr.msra.gmra.mrb[0].mxu0 (!%p863_p8), %vm394_vm0, %v392_v1 }
 0x13e   : > { %v464_v3 = vpop.f32.mrb[0].mxu0 }
 0x13f   : > { %469 = vst.msk [vmem:[#allocation2] sm:$0xff] %vm468_vm2, %v464_v3  ;;  %v892_v4 = vpop.f32.mrb[1].mxu0 }
 0x140 PF: > { %v471_v5 = vld [vmem:[#allocation6] sm:$0xff]  ;;  %v472_v6 = vld [vmem:[#allocation6 + $0x8] sm:$0xff]  ;;  %v1207_v7 = vmov 0.0|0.0   ;;  %vm1208_vm3 = vmmov 0   ;;  %v1209_v9 = vmov 0.0   ;;  %vm474_vm4 = vcmask 130048  }
 0x141   : > { %916 = vmatprep.subr.bf16.mxu0 %v1207_v7  ;;  %v917_v8 = vpack.c.bf16 %v472_v6, %v471_v5  ;;  %897 = vmatprep.mubr.msk.f32.mxu0 %vm1208_vm3, %v1209_v9  ;;  %v470_v10 = vld [vmem:[%s387_s21] sm:$0x1]  ;;  %v562_v12 = vld [vmem:[#allocation8 + $0x8] sm:$0xff]  ;;  %v563_v14 = vld [vmem:[#allocation8 + $0x10] sm:$0xff]  ;;  %v549_v17 = vlaneseq  ;;  %vm572_vm5 = vcmask 261120   ;;  %v1210_v33 = vmov 0  }
 0x142   : > { %919 = vmatprep.subr.bf16.mxu1 %v1207_v7  ;;  %908 = vmatprep.mubr.msk.f32.mxu1 %vm1208_vm3, %v1209_v9  ;;  %v561_v11 = vld [vmem:[#allocation8] sm:$0xff]  ;;  %v564_v15 = vld [vmem:[#allocation8 + $0x18] sm:$0xff]  ;;  %s873_s25 = sshll.u32 %s1190_s12, 5  ;;  %s753_s16 = sshll.u32 %s384_s22, 4  ;;  %vm736_vm6 = vcmask 58368   ;;  %s1450_s16 = int_to_ptr.vmem [resolvable:$true] %s753_s16 }
 0x143   : > { %918 = vmatpush3.bf16.msra.mxu0 %v917_v8  ;;  %v920_v13 = vpack.c.bf16 %v562_v12, %v561_v11  ;;  %v923_v16 = vpack.c.bf16 %v564_v15, %v563_v14  ;;  %v550_v18 = vshrl.u32 %v549_v17, 7  ;;  %v473_v19 = vld [vmem:[%s1503_s4] sm:$0x1]  ;;  %1019 = vset.pattern.permute.xlu0 %v1210_v33  ;;  %s1448_s24 = scalar_lea.hbm %s1508_s9, %s873_s25  ;;  %s739_s12 = scalar_lea.sflag [#allocation5], %s382_s27 }
 0x144   : > { %911 = vmatprep.subr.mxu0 %v1209_v9  ;;  %v654_v32 = vld [vmem:[%s1507_s8] sm:$0x3]  ;;  %s1112_s18 = scalar_lea.vmem %s1450_s16, 32  ;;  %p1534_p11 = scmp.ne.s32.totalorder %s1523_s19, 0 }
 0x145   : > { %921 = vmatpush3.bf16.msra.mxu1 %v920_v13  ;;  %v551_v20 = vsub.s32 0, %v550_v18  ;;  %657 = vperm.xlu0 %1019, %v654_v32   ;;  %v867_v34 = vld [vmem:[%s1505_s6] ss:$0 sm:$0xff]  ;;  %p1113_p10 = scmp.ne.s32.totalorder %s1450_s16, %s1112_s18  ;;  %s1211_s15 = smov [#allocation9]  }
 0x146   : > { %898 = vmatmul.mubr.msk.f32.vlgmr.msra.gmra.mrb[0].mxu0 %vm474_vm4, %v470_v10  ;;  %922 = vmatprep.subr.bf16.mxu1 %v1207_v7  ;;  %v548_v24 = vld [vmem:[#allocation2] sm:$0xff]  ;;  %s1116_s20 = sshll.u32 %s1211_s15, 4  ;;  %s1117_s20 = int_to_ptr.vmem [resolvable:$false] %s1116_s20 }
 0x147   : > { %913 = vmatprep.mubr.msk.f32.mxu0 %vm1208_vm3, %v1209_v9  ;;  %v653_v43 = vld [vmem:[%s1506_s7] sm:$0x3]  ;;  %p1114_p0 = pnand %p1113_p10, %p1534_p11  ;;  %s1118_s28 = scalar_lea.vmem %s1117_s20, 64 }
 0x148   : > { %p1119_p3 = scmp.lt.s32.totalorder %s1450_s16, %s1117_s20  ;;  %p1120_p5 = scmp.lt.s32.totalorder %s1118_s28, %s1112_s18 }
 0x149   : > { %924 = vmatpush3.bf16.msra.mxu1 %v923_v16  ;;  %p1115_p2 = pneg %p1114_p0 }
 0x14a   : > { %p1121_p6 = por %p1120_p5, %p1119_p3 }
 0x14c   : > { %p1122_p7 = pnand %p1121_p6, %p1115_p2 }
 0x1c4   : > { %v658_v44 = vpop.permute.xlu0 %657 }
 0x219   : > { %v544_v21 = vpop.f32.mrb[0].mxu0 }
 0x21a   : > { %v545_v22 = vadd.f32 %v544_v21, %v473_v19  ;;  %v899_v23 = vpop.f32.mrb[1].mxu0 }
 0x21c   : > { %v552_v25 = vrot.slane %v545_v22, %v551_v20 }
 0x21e   : > { %v553_v26 = vadd.f32 %v552_v25, %v548_v24 }
 0x220   : > { %v866_v27 = vmul.f32 -1.442695, %v553_v26 }
 0x222   : > { %1020 = vpow2.f32 %v866_v27 }
 0x22c   : > { %v1021_v28 = vpop.eup %1020 }
 0x22d   : > { %v557_v29 = vadd.f32 1.0, %v1021_v28 }
 0x22f   : > { %1022 = vrcp.f32 %v557_v29 }
 0x239   : > { %v1023_v30 = vpop.eup %1022 }
 0x23a   : > { %v560_v31 = vmul.f32 %v1023_v30, %v553_v26 }
 0x23c   : > { %909 = vmatmul.mubr.msk.f32.vlgmr.msra.gmra.mrb[0].mxu1 %vm572_vm5, %v560_v31 }
 0x30f   : > { %v642_v35 = vpop.f32.mrb[0].mxu1 }
 0x310   : > { %v643_v36 = vadd.f32 %v867_v34, %v642_v35  ;;  %v910_v37 = vpop.f32.mrb[1].mxu1 }
 0x312   : > { %v869_v38 = vmul.f32 -1.442695, %v643_v36 }
 0x314   : > { %1024 = vpow2.f32 %v869_v38 }
 0x31e   : > { %v1025_v39 = vpop.eup %1024 }
 0x31f   : > { %v649_v40 = vadd.f32 1.0, %v1025_v39 }
 0x321   : > { %1026 = vrcp.f32 %v649_v40 }
 0x32b   : > { %v1027_v41 = vpop.eup %1026 }
 0x32c   : > { %v652_v42 = vmul.f32 %v1027_v41, %v643_v36 }
 0x32e   : > { %912 = vmatpush3.xpose.msk.msra.mxu0 %vm572_vm5, %v652_v42 }
 0x331   : > { %914 = vmatmul.mubr.msk.f32.vlgmr.msra.gmra.mrb[2].mxu0 %vm572_vm5, %v653_v43 }
 0x404   : > { %v732_v45 = vpop.f32.mrb[2].mxu0 }
 0x405   : > { %v733_v46 = vadd.f32 %v732_v45, %v658_v44  ;;  %v915_v47 = vpop.f32.mrb[3].mxu0 }
 0x407   : > { %737 = vst.msk [vmem:[%s384_s22] sm:$0x3] %vm736_vm6, %v733_v46 }
 0x408   : > { %1125 = shalt.err (!%p1122_p7)
}
 0x409   : > { %s1126_s27 = scalar_lea.hbm %s1448_s24, 32  ;;  %s1130_s13 = scalar_lea.hbm %s1508_s9, 64 }
 0x40a   : > { %p1127_p9 = scmp.ne.s32.totalorder %s1448_s24, %s1126_s27  ;;  %p1131_p1 = scmp.lt.u32.totalorder %s1448_s24, %s1508_s9 }
 0x40b   : > { %p1132_p13 = scmp.lt.u32.totalorder %s1130_s13, %s1126_s27  ;;  %p1134_p10 = scmp.lt.u32.totalorder %s1126_s27, %s1448_s24 }
 0x40c   : > { %p1128_p12 = pnand %p1127_p9, %p1534_p11 }
 0x40d   : > { %p1133_p8 = por %p1132_p13, %p1131_p1 }
 0x40e   : > { %p1129_p4 = pneg %p1128_p12 }
 0x40f   : > { %p1135_p0 = por %p1134_p10, %p1133_p8 }
 0x411   : > { %p1136_p2 = pnand %p1135_p0, %p1129_p4 }
 0x413   : > { %1139 = shalt.err (!%p1136_p2)
}
 0x414   : > { %937 = dma.vmem_to_hbm [thread:$0]  (%p1534_p11), %s1450_s16, 32, %s1448_s24, %s739_s12  }
 0x415 PF: > { %s1535_s17 = sld [smem:[#allocation13_spill]]  ;;  %s1536_s26 = sld [smem:[#allocation17_spill]] }
 0x416   : > { %p959_p3 = scmp.ge.s32.totalorder %s1198_s14, 2 }
 0x41b   : > { %s765_s25 = sand.u32 1, %s1535_s17   ;;  %p1537_p5 = scmp.ne.s32.totalorder %s1536_s26, 0 }
 0x41c   : > { %s766_s30 = scalar_lea.sflag [#allocation5], %s765_s25 }
 0x41d   : > { %p950_p6 = pnand %p959_p3, %p1537_p5 }
 0x41f   : > { %1173 = dma.done.wait (!%p950_p6), %s766_s30, 32  }
 0x420   : > { %1175 = vsyncadd (!%p950_p6), %s766_s30, 4294967264  ;;  %s24_s14 = sadd.s32 1, %s1198_s14   ;;  %s1538_s21 = sld [smem:[#allocation14_spill]] }
 0x421   : > { %p21_p7 = scmp.ge.s32.totalorder %s24_s14, 4   ;;  %s1539_s11 = sld [smem:[#allocation18_spill]] }
 0x422   : > { %s1540_s12 = sld [smem:[#allocation15_spill]]  ;;  %s1541_s13 = sld [smem:[#allocation16_spill]] }
 0x423   : > { %s1542_s30 = smov %s1182_s10  ;;  %23 = sbr.rel (!%p21_p7) target bundleno = 6 (0x6), region = 109 }
 0x426   : > { %s1543_s10 = smov %s1538_s21 }
 0x42a   :  { %771 = vsyncpa [#allocation4], 1 }
 0x42b   :  { %773 = vsyncpa [#allocation4 + $0x1], 1 }
 0x42c   :  { %774 = vsyncpa [#allocation7], 1 }
 0x42d   :  { %775 = vsyncpa [#allocation5], 1 }
 0x42e   :  { %777 = vsyncpa [#allocation5 + $0x1], 1 }

</bundles_post_ra>
